<compile_context>
chip_gen: v7x
topology: tpu7x:2x2x1
jax: 0.10.0
libtpu: 0.0.40
codegen_flags: <defaults>
</compile_context>

<pallas_src>
import jax
import jax.numpy as jnp
from jax.experimental import pallas as pl
from jax.experimental.pallas import tpu as pltpu

IN_F = 15
HID_F = 8
OUT_F = 4

# ---- tile caps derived from PADDED VMEM layout --------------------------------
# Row-major path: x block (TB, 15) -> padded (TB, 128) -> TB*512 B per buffer,
# out block (TB, 4) -> padded (TB, 128) -> TB*512 B per buffer.
# Double-buffered total ~= 4 * TB * 512 B  ->  16 MiB at TB = 8192.
MAX_BATCH_TILE = 8192
# Features-major path: x block (15, TB) -> padded (16, TB) -> 64*TB B per buffer,
# out block (4, TB) -> padded (8, TB) -> 32*TB B per buffer.
# Double-buffered total ~= 192 * TB B  ->  6 MiB at TB = 32768.
MAX_BATCH_TILE_FMAJOR = 32768

# Below this many rows a single grid step is fine; above it we force >= 2 steps
# so the "parallel" batch axis can shard across v7x's two TensorCores.
_MEGACORE_SPLIT_THRESHOLD = 1024


def _round_up(n, m):
    return ((n + m - 1) // m) * m


def _pick_batch_tile(B, cap, align):
    B = max(int(B), 1)
    if B <= _MEGACORE_SPLIT_THRESHOLD:
        # One full-extent block (block dim == array dim is always legal);
        # no masked tail, and splitting tiny batches across TCs gains nothing.
        return min(B, cap)
    # Aim for >= 2 grid steps so both v7x TensorCores get work.
    return min(cap, _round_up(pl.cdiv(B, 2), align))


# ---- kernels -------------------------------------------------------------------

def mlp_kernel(x_ref, w1_ref, b1_ref, w2_ref, b2_ref, o_ref):
    # Row-major layout: x (TB, 15) -> out (TB, 4).
    x = x_ref[...].astype(jnp.float32)   # bf16 producers upcast here (VPU cast)
    h = jnp.dot(x, w1_ref[...], preferred_element_type=jnp.float32) + b1_ref[...]
    h = jnp.maximum(h, 0.0)               # ReLU on the VPU
    o = jnp.dot(h, w2_ref[...], preferred_element_type=jnp.float32) + b2_ref[...]
    o_ref[...] = o.astype(o_ref.dtype)
    # TODO(synk): if a bundle dump ever shows MXU weight-staging / result-FIFO
    # latency on the critical path (K=15 / N=8 is ~1% MXU utilization), replace
    # the two jnp.dot calls with 15 + 8 VPU broadcast-FMAs.  Compute is
    # currently hidden under the DMA, so this is not done preemptively.


def mlp_kernel_fmajor(xT_ref, w1t_ref, b1c_ref, w2t_ref, b2c_ref, oT_ref):
    # Batch-in-lanes layout: xT (15, TB) -> outT (4, TB).  Lane-dense stores.
    xT = xT_ref[...].astype(jnp.float32)
    h = jnp.dot(w1t_ref[...], xT, preferred_element_type=jnp.float32) + b1c_ref[...]
    h = jnp.maximum(h, 0.0)
    o = jnp.dot(w2t_ref[...], h, preferred_element_type=jnp.float32) + b2c_ref[...]
    oT_ref[...] = o.astype(oT_ref.dtype)


# ---- wrappers ------------------------------------------------------------------

def _cost(B, in_itemsize):
    param_bytes = (IN_F * HID_F + HID_F + HID_F * OUT_F + OUT_F) * 4
    return pl.CostEstimate(
        flops=2 * B * (IN_F * HID_F + HID_F * OUT_F),
        transcendentals=0,
        bytes_accessed=B * IN_F * in_itemsize + B * OUT_F * 4 + param_bytes,
    )


def phishing_forward(x, w1, b1, w2, b2, *, batch_tile=None):
    """out = relu(x @ w1 + b1) @ w2 + b2 with x: (B, 15) -> out: (B, 4).

    Row-major layout matching the PyTorch module contract.  x may be float32
    or bfloat16 (upcast to f32 inside the kernel).
    """
    B = x.shape[0]
    if batch_tile is None:
        batch_tile = _pick_batch_tile(B, MAX_BATCH_TILE, 8)
    else:
        batch_tile = max(8, _round_up(int(batch_tile), 8))
    grid = (pl.cdiv(B, batch_tile),)

    return pl.pallas_call(
        mlp_kernel,
        out_shape=jax.ShapeDtypeStruct((B, OUT_F), jnp.float32),
        grid_spec=pltpu.PrefetchScalarGridSpec(
            num_scalar_prefetch=0,
            grid=grid,
            in_specs=[
                pl.BlockSpec((batch_tile, IN_F), lambda i: (i, 0)),  # x (2-buffered)
                pl.BlockSpec((IN_F, HID_F), lambda i: (0, 0)),       # W1 (resident)
                pl.BlockSpec((1, HID_F), lambda i: (0, 0)),          # b1
                pl.BlockSpec((HID_F, OUT_F), lambda i: (0, 0)),      # W2
                pl.BlockSpec((1, OUT_F), lambda i: (0, 0)),          # b2
            ],
            out_specs=pl.BlockSpec((batch_tile, OUT_F), lambda i: (i, 0)),
        ),
        compiler_params=pltpu.CompilerParams(
            dimension_semantics=("parallel",),   # batch axis -> both TCs on v7x
        ),
        cost_estimate=_cost(B, x.dtype.itemsize),
    )(x, w1, b1, w2, b2)


def phishing_forward_features_major(x_t, w1, b1, w2, b2, *, batch_tile=None):
    """Batch-in-lanes variant: x_t is (15, B), result is (4, B).

    Output last dim is the batch => lane-dense, unmasked stores and efficient
    output DMA; padded VMEM per buffer drops ~8x vs. the row-major layout, so
    32K-row tiles fit on every generation.  Use only when the producer can
    supply (15, B) and the consumer accepts (4, B) — a wrapper-side transpose
    would cost more HBM traffic than this layout saves.
    """
    B = x_t.shape[1]
    if batch_tile is None:
        batch_tile = _pick_batch_tile(B, MAX_BATCH_TILE_FMAJOR, 128)
    else:
        batch_tile = max(128, _round_up(int(batch_tile), 128))
    grid = (pl.cdiv(B, batch_tile),)

    # Tiny parameter relayouts (<= 120 elements each), done once outside the grid.
    w1t = jnp.transpose(w1)               # (8, 15)
    w2t = jnp.transpose(w2)               # (4, 8)
    b1c = jnp.reshape(b1, (HID_F, 1))     # (8, 1)
    b2c = jnp.reshape(b2, (OUT_F, 1))     # (4, 1)

    return pl.pallas_call(
        mlp_kernel_fmajor,
        out_shape=jax.ShapeDtypeStruct((OUT_F, B), jnp.float32),
        grid_spec=pltpu.PrefetchScalarGridSpec(
            num_scalar_prefetch=0,
            grid=grid,
            in_specs=[
                pl.BlockSpec((IN_F, batch_tile), lambda i: (0, i)),  # xT tile
                pl.BlockSpec((HID_F, IN_F), lambda i: (0, 0)),       # W1^T
                pl.BlockSpec((HID_F, 1), lambda i: (0, 0)),          # b1 col
                pl.BlockSpec((OUT_F, HID_F), lambda i: (0, 0)),      # W2^T
                pl.BlockSpec((OUT_F, 1), lambda i: (0, 0)),          # b2 col
            ],
            out_specs=pl.BlockSpec((OUT_F, batch_tile), lambda i: (0, i)),
        ),
        compiler_params=pltpu.CompilerParams(
            dimension_semantics=("parallel",),
        ),
        cost_estimate=_cost(B, x_t.dtype.itemsize),
    )(x_t, w1t, b1c, w2t, b2c)


def init_params(key):
    """Deterministic init matching nn.Linear shapes (uniform +/- 1/sqrt(fan_in))."""
    k1, k2, k3, k4 = jax.random.split(key, 4)
    bound1 = 1.0 / jnp.sqrt(IN_F)
    bound2 = 1.0 / jnp.sqrt(HID_F)
    w1 = jax.random.uniform(k1, (IN_F, HID_F), jnp.float32, -bound1, bound1)
    b1 = jax.random.uniform(k2, (1, HID_F), jnp.float32, -bound1, bound1)
    w2 = jax.random.uniform(k3, (HID_F, OUT_F), jnp.float32, -bound2, bound2)
    b2 = jax.random.uniform(k4, (1, OUT_F), jnp.float32, -bound2, bound2)
    return w1, b1, w2, b2


if __name__ == "__main__":
    key = jax.random.PRNGKey(0)
    k_x, k_x2, k_p = jax.random.split(key, 3)
    w1, b1, w2, b2 = init_params(k_p)

    def ref_fn(x):
        return jnp.maximum(x @ w1 + b1, 0.0) @ w2 + b2

    # 1) row-major path, aligned batch
    B = 256
    x = jax.random.normal(k_x, (B, IN_F), jnp.float32)
    out = jax.block_until_ready(phishing_forward(x, w1, b1, w2, b2))
    assert out.shape == (B, OUT_F)
    assert jnp.allclose(out, ref_fn(x), atol=1e-5, rtol=1e-5)

    # 2) row-major path, ragged batch (not a multiple of 8)
    B2 = 100
    x2 = jax.random.normal(k_x2, (B2, IN_F), jnp.float32)
    out2 = jax.block_until_ready(phishing_forward(x2, w1, b1, w2, b2))
    assert out2.shape == (B2, OUT_F)
    assert jnp.allclose(out2, ref_fn(x2), atol=1e-5, rtol=1e-5)

    # 3) row-major path with bf16 input (upcast inside the kernel)
    x_bf = x.astype(jnp.bfloat16)
    out_bf = jax.block_until_ready(phishing_forward(x_bf, w1, b1, w2, b2))
    assert out_bf.shape == (B, OUT_F)
    assert jnp.allclose(out_bf, ref_fn(x_bf.astype(jnp.float32)), atol=1e-5, rtol=1e-5)

    # 4) batch-in-lanes path (lane-dense output), aligned and ragged
    out_t = jax.block_until_ready(
        phishing_forward_features_major(x.T, w1, b1, w2, b2))
    assert out_t.shape == (OUT_F, B)
    assert jnp.allclose(out_t, ref_fn(x).T, atol=1e-5, rtol=1e-5)

    out_t2 = jax.block_until_ready(
        phishing_forward_features_major(x2.T, w1, b1, w2, b2))
    assert out_t2.shape == (OUT_F, B2)
    assert jnp.allclose(out_t2, ref_fn(x2).T, atol=1e-5, rtol=1e-5)

    print("KERNEL_OK")
</pallas_src>

<mosaic_0001>
module attributes {stable_mosaic.version = 11 : i64} {
  func.func @mlp_kernel(%arg0: i32, %arg1: memref<256x15xf32, #tpu.memory_space<vmem>>, %arg2: memref<15x8xf32, #tpu.memory_space<vmem>>, %arg3: memref<1x8xf32, #tpu.memory_space<vmem>>, %arg4: memref<8x4xf32, #tpu.memory_space<vmem>>, %arg5: memref<1x4xf32, #tpu.memory_space<vmem>>, %arg6: memref<256x4xf32, #tpu.memory_space<vmem>>) attributes {dimension_semantics = [#tpu.dimension_semantics<parallel>], iteration_bounds = array<i64: 1>, scalar_prefetch = 0 : i64, scratch_operands = 0 : i64, tpu.core_type = #tpu.core_type<tc>, window_params = [{transform_indices = @transform_0, window_bounds = array<i64: 256, 15>}, {pipeline_mode = #tpu.pipeline_mode<synchronous>, transform_indices = @transform_1, window_bounds = array<i64: 15, 8>}, {pipeline_mode = #tpu.pipeline_mode<synchronous>, transform_indices = @transform_2, window_bounds = array<i64: 1, 8>}, {pipeline_mode = #tpu.pipeline_mode<synchronous>, transform_indices = @transform_3, window_bounds = array<i64: 8, 4>}, {pipeline_mode = #tpu.pipeline_mode<synchronous>, transform_indices = @transform_4, window_bounds = array<i64: 1, 4>}, {transform_indices = @transform_5, window_bounds = array<i64: 256, 4>}]} {
    %c0 = arith.constant 0 : index
    %c0_0 = arith.constant 0 : index
    %0 = vector.load %arg1[%c0, %c0_0] : memref<256x15xf32, #tpu.memory_space<vmem>>, vector<256x15xf32>
    %c0_1 = arith.constant 0 : index
    %c0_2 = arith.constant 0 : index
    %1 = vector.load %arg2[%c0_1, %c0_2] : memref<15x8xf32, #tpu.memory_space<vmem>>, vector<15x8xf32>
    %cst = arith.constant dense<0.000000e+00> : vector<256x8xf32>
    %2 = tpu.matmul %0, %1, %cst {dimension_numbers = #tpu.dot_dimension_numbers<[1], [0], [0], [1], [0, 0, 1, 1], [], []>} : vector<256x15xf32>, vector<15x8xf32>, vector<256x8xf32> -> vector<256x8xf32>
    %c0_3 = arith.constant 0 : index
    %c0_4 = arith.constant 0 : index
    %3 = vector.load %arg3[%c0_3, %c0_4] : memref<1x8xf32, #tpu.memory_space<vmem>>, vector<1x8xf32>
    %4 = vector.broadcast %3 : vector<1x8xf32> to vector<256x8xf32>
    %5 = arith.addf %2, %4 : vector<256x8xf32>
    %cst_5 = arith.constant 0.000000e+00 : f32
    %6 = vector.broadcast %cst_5 : f32 to vector<256x8xf32>
    %7 = arith.maximumf %5, %6 : vector<256x8xf32>
    %c0_6 = arith.constant 0 : index
    %c0_7 = arith.constant 0 : index
    %8 = vector.load %arg4[%c0_6, %c0_7] : memref<8x4xf32, #tpu.memory_space<vmem>>, vector<8x4xf32>
    %cst_8 = arith.constant dense<0.000000e+00> : vector<256x4xf32>
    %9 = tpu.matmul %7, %8, %cst_8 {dimension_numbers = #tpu.dot_dimension_numbers<[1], [0], [0], [1], [0, 0, 1, 1], [], []>} : vector<256x8xf32>, vector<8x4xf32>, vector<256x4xf32> -> vector<256x4xf32>
    %c0_9 = arith.constant 0 : index
    %c0_10 = arith.constant 0 : index
    %10 = vector.load %arg5[%c0_9, %c0_10] : memref<1x4xf32, #tpu.memory_space<vmem>>, vector<1x4xf32>
    %11 = vector.broadcast %10 : vector<1x4xf32> to vector<256x4xf32>
    %12 = arith.addf %9, %11 : vector<256x4xf32>
    %c0_11 = arith.constant 0 : index
    %c0_12 = arith.constant 0 : index
    %13 = vector.load %arg6[%c0_11, %c0_12] : memref<256x4xf32, #tpu.memory_space<vmem>>, vector<256x4xf32>
    tpu.vector_store %arg6[%c0_11, %c0_12], %12 {strides = array<i32>} : memref<256x4xf32, #tpu.memory_space<vmem>>, vector<256x4xf32>,
    return
  }
  func.func @transform_0(%arg0: i32) -> (i32, i32) {
    %c0_i32 = arith.constant 0 : i32
    %c0_i32_0 = arith.constant 0 : i32
    return %arg0, %c0_i32 : i32, i32
  }
  func.func @transform_1(%arg0: i32) -> (i32, i32) {
    %c0_i32 = arith.constant 0 : i32
    %c0_i32_0 = arith.constant 0 : i32
    %c0_i32_1 = arith.constant 0 : i32
    return %c0_i32, %c0_i32_0 : i32, i32
  }
  func.func @transform_2(%arg0: i32) -> (i32, i32) {
    %c0_i32 = arith.constant 0 : i32
    %c0_i32_0 = arith.constant 0 : i32
    %c0_i32_1 = arith.constant 0 : i32
    return %c0_i32, %c0_i32_0 : i32, i32
  }
  func.func @transform_3(%arg0: i32) -> (i32, i32) {
    %c0_i32 = arith.constant 0 : i32
    %c0_i32_0 = arith.constant 0 : i32
    %c0_i32_1 = arith.constant 0 : i32
    return %c0_i32, %c0_i32_0 : i32, i32
  }
  func.func @transform_4(%arg0: i32) -> (i32, i32) {
    %c0_i32 = arith.constant 0 : i32
    %c0_i32_0 = arith.constant 0 : i32
    %c0_i32_1 = arith.constant 0 : i32
    return %c0_i32, %c0_i32_0 : i32, i32
  }
  func.func @transform_5(%arg0: i32) -> (i32, i32) {
    %c0_i32 = arith.constant 0 : i32
    %c0_i32_0 = arith.constant 0 : i32
    return %arg0, %c0_i32 : i32, i32
  }
}

</mosaic_0001>

<bundles_post_ra>
// kernel: tpu_custom_call.1
= control target key start
LH: loop header
LB: loop body
LE: loop exit
PB: predicated region body
PF: predicated region fallthrough
CT: control target
= control target key end

     0   :  { %vm158_vm0 = vcmask 1046528   ;;  %vm61_vm1 = vcmask 121856   ;;  %vm1029_vm2 = vmmov 1   ;;  %vm427_vm4 = vcmask 64512   ;;  %s1431_s1 = inlined_call_operand.vmem [shape: f32[15,8], index: 1, kind: input, shape index: {}]   ;;  %s1432_s0 = inlined_call_operand.vmem [shape: f32[256,15], index: 0, kind: input, shape index: {}]   ;;  %s1433_s3 = inlined_call_operand.vmem [shape: f32[8,4], index: 3, kind: input, shape index: {}]   ;;  %s1434_s2 = inlined_call_operand.vmem [shape: f32[1,8], index: 2, kind: input, shape index: {}]   ;;  %s1435_s4 = inlined_call_operand.vmem [shape: f32[1,4], index: 4, kind: input, shape index: {}]   ;;  %s1436_s5 = inlined_call_operand.vmem [shape: f32[256,4], index: 5, kind: output, shape index: {}]  }
   0x1   :  { %v52_v0 = vld [vmem:[%s1431_s1] sm:$0xff]  ;;  %v53_v1 = vld [vmem:[%s1431_s1 + $0x8] sm:$0x7f]  ;;  %vm1023_vm3 = vmpackc.low %vm158_vm0, %vm1029_vm2  ;;  %vm749_vm5 = vcmask 31744  }
   0x2   :  { %v1022_v2 = vpack.c.bf16 %v53_v1, %v52_v0  ;;  %v20_v3 = vld [vmem:[%s1432_s0] sm:$0xff]  ;;  %v21_v4 = vld [vmem:[%s1432_s0 + $0x8] sm:$0xff]  ;;  %v22_v5 = vld [vmem:[%s1432_s0 + $0x10] sm:$0xff] }
   0x3   :  { %924 = vmatprep.mubr.msk.f32.mxu0 %vm61_vm1, %v20_v3  ;;  %v23_v6 = vld [vmem:[%s1432_s0 + $0x18] sm:$0xff]  ;;  %v24_v7 = vld [vmem:[%s1432_s0 + $0x20] sm:$0xff]  ;;  %v25_v8 = vld [vmem:[%s1432_s0 + $0x28] sm:$0xff] }
   0x4   :  { %1024 = vmatprep.subr.msk.bf16.mxu0 %vm1023_vm3, %v1022_v2  ;;  %v26_v9 = vld [vmem:[%s1432_s0 + $0x30] sm:$0xff]  ;;  %v27_v10 = vld [vmem:[%s1432_s0 + $0x38] sm:$0xff]  ;;  %v28_v11 = vld [vmem:[%s1432_s0 + $0x40] sm:$0xff] }
   0x5   :  { %1027 = vmatpush3.bf16.msk.msra.mxu0 %vm1023_vm3, %v1022_v2  ;;  %v29_v12 = vld [vmem:[%s1432_s0 + $0x48] sm:$0xff]  ;;  %v30_v13 = vld [vmem:[%s1432_s0 + $0x50] sm:$0xff]  ;;  %v31_v14 = vld [vmem:[%s1432_s0 + $0x58] sm:$0xff] }
   0x6   :  { %v32_v15 = vld [vmem:[%s1432_s0 + $0x60] sm:$0xff]  ;;  %v33_v16 = vld [vmem:[%s1432_s0 + $0x68] sm:$0xff]  ;;  %v34_v17 = vld [vmem:[%s1432_s0 + $0x70] sm:$0xff] }
   0x7   :  { %v35_v18 = vld [vmem:[%s1432_s0 + $0x78] sm:$0xff]  ;;  %v36_v19 = vld [vmem:[%s1432_s0 + $0x80] sm:$0xff]  ;;  %v37_v20 = vld [vmem:[%s1432_s0 + $0x88] sm:$0xff] }
   0x8   :  { %925 = vmatmul.mubr.msk.f32.vlgmr.msra.gmra.mrb[0].mxu0 %vm61_vm1, %v21_v4  ;;  %v38_v21 = vld [vmem:[%s1432_s0 + $0x90] sm:$0xff]  ;;  %v39_v22 = vld [vmem:[%s1432_s0 + $0x98] sm:$0xff]  ;;  %v40_v23 = vld [vmem:[%s1432_s0 + $0xa0] sm:$0xff] }
   0x9   :  { %927 = vmatprep.mubr.msk.f32.mxu0 %vm61_vm1, %v22_v5  ;;  %v41_v24 = vld [vmem:[%s1432_s0 + $0xa8] sm:$0xff]  ;;  %v42_v25 = vld [vmem:[%s1432_s0 + $0xb0] sm:$0xff]  ;;  %v43_v26 = vld [vmem:[%s1432_s0 + $0xb8] sm:$0xff] }
   0xa   :  { %v44_v27 = vld [vmem:[%s1432_s0 + $0xc0] sm:$0xff]  ;;  %v45_v28 = vld [vmem:[%s1432_s0 + $0xc8] sm:$0xff]  ;;  %v46_v29 = vld [vmem:[%s1432_s0 + $0xd0] sm:$0xff] }
   0xb   :  { %v47_v30 = vld [vmem:[%s1432_s0 + $0xd8] sm:$0xff]  ;;  %v48_v31 = vld [vmem:[%s1432_s0 + $0xe0] sm:$0xff]  ;;  %v49_v32 = vld [vmem:[%s1432_s0 + $0xe8] sm:$0xff] }
   0xc   :  { %928 = vmatmul.mubr.msk.f32.gmra.mrb[2].mxu0 %vm61_vm1, %v23_v6  ;;  %v50_v33 = vld [vmem:[%s1432_s0 + $0xf0] sm:$0xff]  ;;  %v51_v34 = vld [vmem:[%s1432_s0 + $0xf8] sm:$0xff]  ;;  %v419_v35 = vld [vmem:[%s1433_s3] sm:$0xff] }
   0xd   :  { %930 = vmatprep.mubr.msk.f32.mxu0 %vm61_vm1, %v24_v7  ;;  %972 = vmatprep.subr.mxu1 %v419_v35  ;;  %v1200_v36 = vld [vmem:[%s1434_s2] ss:$0 sm:$0xff] }
   0xe   :  { %973 = vmatpush3.msra.mxu1 %v419_v35 }
  0x10   :  { %931 = vmatmul.mubr.msk.f32.gmra.mrb[4].mxu0 %vm61_vm1, %v25_v8 }
  0x11   :  { %933 = vmatprep.mubr.msk.f32.mxu0 %vm61_vm1, %v26_v9 }
  0x14   :  { %934 = vmatmul.mubr.msk.f32.gmra.mrb[6].mxu0 %vm61_vm1, %v27_v10 }
  0x15   :  { %936 = vmatprep.mubr.msk.f32.mxu0 %vm61_vm1, %v28_v11 }
  0x18   :  { %937 = vmatmul.mubr.msk.f32.gmra.mrb[8].mxu0 %vm61_vm1, %v29_v12 }
  0x19   :  { %939 = vmatprep.mubr.msk.f32.mxu0 %vm61_vm1, %v30_v13 }
  0x1c   :  { %940 = vmatmul.mubr.msk.f32.gmra.mrb[10].mxu0 %vm61_vm1, %v31_v14 }
  0x1d   :  { %942 = vmatprep.mubr.msk.f32.mxu0 %vm61_vm1, %v32_v15 }
  0x20   :  { %943 = vmatmul.mubr.msk.f32.gmra.mrb[12].mxu0 %vm61_vm1, %v33_v16 }
  0x21   :  { %945 = vmatprep.mubr.msk.f32.mxu0 %vm61_vm1, %v34_v17 }
  0x24   :  { %946 = vmatmul.mubr.msk.f32.gmra.mrb[14].mxu0 %vm61_vm1, %v35_v18 }
  0x25   :  { %948 = vmatprep.mubr.msk.f32.mxu0 %vm61_vm1, %v36_v19 }
  0x28   :  { %949 = vmatmul.mubr.msk.f32.gmra.mrb[16].mxu0 %vm61_vm1, %v37_v20 }
  0x29   :  { %951 = vmatprep.mubr.msk.f32.mxu0 %vm61_vm1, %v38_v21 }
  0x2c   :  { %952 = vmatmul.mubr.msk.f32.gmra.mrb[18].mxu0 %vm61_vm1, %v39_v22 }
  0x2d   :  { %954 = vmatprep.mubr.msk.f32.mxu0 %vm61_vm1, %v40_v23 }
  0x30   :  { %955 = vmatmul.mubr.msk.f32.gmra.mrb[20].mxu0 %vm61_vm1, %v41_v24 }
  0x31   :  { %957 = vmatprep.mubr.msk.f32.mxu0 %vm61_vm1, %v42_v25 }
  0x34   :  { %958 = vmatmul.mubr.msk.f32.gmra.mrb[22].mxu0 %vm61_vm1, %v43_v26 }
  0x35   :  { %960 = vmatprep.mubr.msk.f32.mxu0 %vm61_vm1, %v44_v27 }
  0x38   :  { %961 = vmatmul.mubr.msk.f32.gmra.mrb[24].mxu0 %vm61_vm1, %v45_v28 }
  0x39   :  { %963 = vmatprep.mubr.msk.f32.mxu0 %vm61_vm1, %v46_v29 }
  0x3c   :  { %964 = vmatmul.mubr.msk.f32.gmra.mrb[26].mxu0 %vm61_vm1, %v47_v30 }
  0x3d   :  { %966 = vmatprep.mubr.msk.f32.mxu0 %vm61_vm1, %v48_v31 }
  0x40   :  { %967 = vmatmul.mubr.msk.f32.gmra.mrb[28].mxu0 %vm61_vm1, %v49_v32 }
  0x41   :  { %969 = vmatprep.mubr.msk.f32.mxu0 %vm61_vm1, %v50_v33 }
  0x44   :  { %970 = vmatmul.mubr.msk.f32.gmra.mrb[30].mxu0 %vm61_vm1, %v51_v34 }
  0xdb   :  { %v926_v37 = vpop.f32.mrb[0].mxu0 }
  0xdc   :  { %v234_v38 = vadd.f32 %v926_v37, %v1200_v36  ;;  %v228_v39 = vpop.f32.mrb[1].mxu0 }
  0xdd   :  { %v229_v40 = vadd.f32 %v1200_v36, %v228_v39 }
  0xde   :  { %v388_v43 = vmax.f32 %v234_v38, 0.0 }
  0xdf   :  { %v387_v41 = vmax.f32 %v229_v40, 0.0  ;;  %v929_v42 = vpop.f32.mrb[2].mxu0 }
  0xe0   :  { %v244_v44 = vadd.f32 %v929_v42, %v1200_v36  ;;  %v238_v45 = vpop.f32.mrb[3].mxu0 }
  0xe1   :  { %v239_v46 = vadd.f32 %v1200_v36, %v238_v45  ;;  %974 = vmatprep.mubr.msk.f32.mxu1 %vm427_vm4, %v387_v41 }
  0xe2   :  { %975 = vmatmul.mubr.msk.f32.vlgmr.msra.gmra.mrb[0].mxu1 %vm427_vm4, %v388_v43  ;;  %v390_v49 = vmax.f32 %v244_v44, 0.0 }
  0xe3   :  { %v389_v47 = vmax.f32 %v239_v46, 0.0  ;;  %v932_v48 = vpop.f32.mrb[4].mxu0 }
  0xe4   :  { %v254_v50 = vadd.f32 %v932_v48, %v1200_v36  ;;  %v248_v51 = vpop.f32.mrb[5].mxu0 }
  0xe5   :  { %v249_v52 = vadd.f32 %v1200_v36, %v248_v51  ;;  %977 = vmatprep.mubr.msk.f32.mxu1 %vm427_vm4, %v389_v47 }
  0xe6   :  { %978 = vmatmul.mubr.msk.f32.gmra.mrb[2].mxu1 %vm427_vm4, %v390_v49  ;;  %v392_v55 = vmax.f32 %v254_v50, 0.0 }
  0xe7   :  { %v391_v53 = vmax.f32 %v249_v52, 0.0  ;;  %v935_v54 = vpop.f32.mrb[6].mxu0 }
  0xe8   :  { %v264_v56 = vadd.f32 %v935_v54, %v1200_v36  ;;  %v258_v57 = vpop.f32.mrb[7].mxu0 }
  0xe9   :  { %v259_v58 = vadd.f32 %v1200_v36, %v258_v57  ;;  %980 = vmatprep.mubr.msk.f32.mxu1 %vm427_vm4, %v391_v53 }
  0xea   :  { %981 = vmatmul.mubr.msk.f32.gmra.mrb[4].mxu1 %vm427_vm4, %v392_v55  ;;  %v394_v61 = vmax.f32 %v264_v56, 0.0 }
  0xeb   :  { %v393_v59 = vmax.f32 %v259_v58, 0.0  ;;  %v938_v60 = vpop.f32.mrb[8].mxu0 }
  0xec   :  { %v274_v62 = vadd.f32 %v938_v60, %v1200_v36  ;;  %v268_v63 = vpop.f32.mrb[9].mxu0 }
  0xed   :  { %v269_v0 = vadd.f32 %v1200_v36, %v268_v63  ;;  %983 = vmatprep.mubr.msk.f32.mxu1 %vm427_vm4, %v393_v59 }
  0xee   :  { %984 = vmatmul.mubr.msk.f32.gmra.mrb[6].mxu1 %vm427_vm4, %v394_v61  ;;  %v396_v3 = vmax.f32 %v274_v62, 0.0 }
  0xef   :  { %v395_v1 = vmax.f32 %v269_v0, 0.0  ;;  %v941_v2 = vpop.f32.mrb[10].mxu0 }
  0xf0   :  { %v284_v4 = vadd.f32 %v941_v2, %v1200_v36  ;;  %v278_v5 = vpop.f32.mrb[11].mxu0 }
  0xf1   :  { %v279_v6 = vadd.f32 %v1200_v36, %v278_v5  ;;  %986 = vmatprep.mubr.msk.f32.mxu1 %vm427_vm4, %v395_v1 }
  0xf2   :  { %987 = vmatmul.mubr.msk.f32.gmra.mrb[8].mxu1 %vm427_vm4, %v396_v3  ;;  %v398_v9 = vmax.f32 %v284_v4, 0.0 }
  0xf3   :  { %v397_v7 = vmax.f32 %v279_v6, 0.0  ;;  %v944_v8 = vpop.f32.mrb[12].mxu0  ;;  %v1269_v6 = vld [vmem:[%s1435_s4] ss:$0 sm:$0xff] }
  0xf4   :  { %v294_v10 = vadd.f32 %v944_v8, %v1200_v36  ;;  %v288_v11 = vpop.f32.mrb[13].mxu0 }
  0xf5   :  { %v289_v12 = vadd.f32 %v1200_v36, %v288_v11  ;;  %989 = vmatprep.mubr.msk.f32.mxu1 %vm427_vm4, %v397_v7 }
  0xf6   :  { %990 = vmatmul.mubr.msk.f32.gmra.mrb[10].mxu1 %vm427_vm4, %v398_v9  ;;  %v400_v15 = vmax.f32 %v294_v10, 0.0 }
  0xf7   :  { %v399_v13 = vmax.f32 %v289_v12, 0.0  ;;  %v947_v14 = vpop.f32.mrb[14].mxu0 }
  0xf8   :  { %v304_v16 = vadd.f32 %v947_v14, %v1200_v36  ;;  %v298_v17 = vpop.f32.mrb[15].mxu0 }
  0xf9   :  { %v299_v18 = vadd.f32 %v1200_v36, %v298_v17  ;;  %992 = vmatprep.mubr.msk.f32.mxu1 %vm427_vm4, %v399_v13 }
  0xfa   :  { %993 = vmatmul.mubr.msk.f32.gmra.mrb[12].mxu1 %vm427_vm4, %v400_v15  ;;  %v402_v21 = vmax.f32 %v304_v16, 0.0 }
  0xfb   :  { %v401_v19 = vmax.f32 %v299_v18, 0.0  ;;  %v950_v20 = vpop.f32.mrb[16].mxu0 }
  0xfc   :  { %v314_v22 = vadd.f32 %v950_v20, %v1200_v36  ;;  %v308_v23 = vpop.f32.mrb[17].mxu0 }
  0xfd   :  { %v309_v24 = vadd.f32 %v1200_v36, %v308_v23  ;;  %995 = vmatprep.mubr.msk.f32.mxu1 %vm427_vm4, %v401_v19 }
  0xfe   :  { %996 = vmatmul.mubr.msk.f32.gmra.mrb[14].mxu1 %vm427_vm4, %v402_v21  ;;  %v404_v27 = vmax.f32 %v314_v22, 0.0 }
  0xff   :  { %v403_v25 = vmax.f32 %v309_v24, 0.0  ;;  %v953_v26 = vpop.f32.mrb[18].mxu0 }
 0x100   :  { %v324_v28 = vadd.f32 %v953_v26, %v1200_v36  ;;  %v318_v29 = vpop.f32.mrb[19].mxu0 }
 0x101   :  { %v319_v30 = vadd.f32 %v1200_v36, %v318_v29  ;;  %998 = vmatprep.mubr.msk.f32.mxu1 %vm427_vm4, %v403_v25 }
 0x102   :  { %999 = vmatmul.mubr.msk.f32.gmra.mrb[16].mxu1 %vm427_vm4, %v404_v27  ;;  %v406_v33 = vmax.f32 %v324_v28, 0.0 }
 0x103   :  { %v405_v31 = vmax.f32 %v319_v30, 0.0  ;;  %v956_v32 = vpop.f32.mrb[20].mxu0 }
 0x104   :  { %v334_v34 = vadd.f32 %v956_v32, %v1200_v36  ;;  %v328_v35 = vpop.f32.mrb[21].mxu0 }
 0x105   :  { %v329_v37 = vadd.f32 %v1200_v36, %v328_v35  ;;  %1001 = vmatprep.mubr.msk.f32.mxu1 %vm427_vm4, %v405_v31 }
 0x106   :  { %1002 = vmatmul.mubr.msk.f32.gmra.mrb[18].mxu1 %vm427_vm4, %v406_v33  ;;  %v408_v40 = vmax.f32 %v334_v34, 0.0 }
 0x107   :  { %v407_v38 = vmax.f32 %v329_v37, 0.0  ;;  %v959_v39 = vpop.f32.mrb[22].mxu0 }
 0x108   :  { %v344_v41 = vadd.f32 %v959_v39, %v1200_v36  ;;  %v338_v42 = vpop.f32.mrb[23].mxu0 }
 0x109   :  { %v339_v43 = vadd.f32 %v1200_v36, %v338_v42  ;;  %1004 = vmatprep.mubr.msk.f32.mxu1 %vm427_vm4, %v407_v38 }
 0x10a   :  { %1005 = vmatmul.mubr.msk.f32.gmra.mrb[20].mxu1 %vm427_vm4, %v408_v40  ;;  %v410_v46 = vmax.f32 %v344_v41, 0.0 }
 0x10b   :  { %v409_v44 = vmax.f32 %v339_v43, 0.0  ;;  %v962_v45 = vpop.f32.mrb[24].mxu0 }
 0x10c   :  { %v354_v47 = vadd.f32 %v962_v45, %v1200_v36  ;;  %v348_v48 = vpop.f32.mrb[25].mxu0 }
 0x10d   :  { %v349_v49 = vadd.f32 %v1200_v36, %v348_v48  ;;  %1007 = vmatprep.mubr.msk.f32.mxu1 %vm427_vm4, %v409_v44 }
 0x10e   :  { %1008 = vmatmul.mubr.msk.f32.gmra.mrb[22].mxu1 %vm427_vm4, %v410_v46  ;;  %v412_v52 = vmax.f32 %v354_v47, 0.0 }
 0x10f   :  { %v411_v50 = vmax.f32 %v349_v49, 0.0  ;;  %v965_v51 = vpop.f32.mrb[26].mxu0 }
 0x110   :  { %v364_v53 = vadd.f32 %v965_v51, %v1200_v36  ;;  %v358_v54 = vpop.f32.mrb[27].mxu0 }
 0x111   :  { %v359_v55 = vadd.f32 %v1200_v36, %v358_v54  ;;  %1010 = vmatprep.mubr.msk.f32.mxu1 %vm427_vm4, %v411_v50 }
 0x112   :  { %1011 = vmatmul.mubr.msk.f32.gmra.mrb[24].mxu1 %vm427_vm4, %v412_v52  ;;  %v414_v58 = vmax.f32 %v364_v53, 0.0 }
 0x113   :  { %v413_v56 = vmax.f32 %v359_v55, 0.0  ;;  %v968_v57 = vpop.f32.mrb[28].mxu0 }
 0x114   :  { %v374_v59 = vadd.f32 %v968_v57, %v1200_v36  ;;  %v368_v60 = vpop.f32.mrb[29].mxu0 }
 0x115   :  { %v369_v61 = vadd.f32 %v1200_v36, %v368_v60  ;;  %1013 = vmatprep.mubr.msk.f32.mxu1 %vm427_vm4, %v413_v56 }
 0x116   :  { %1014 = vmatmul.mubr.msk.f32.gmra.mrb[26].mxu1 %vm427_vm4, %v414_v58  ;;  %v416_v0 = vmax.f32 %v374_v59, 0.0 }
 0x117   :  { %v415_v62 = vmax.f32 %v369_v61, 0.0  ;;  %v971_v63 = vpop.f32.mrb[30].mxu0 }
 0x118   :  { %v384_v1 = vadd.f32 %v971_v63, %v1200_v36  ;;  %v378_v2 = vpop.f32.mrb[31].mxu0 }
 0x119   :  { %v379_v3 = vadd.f32 %v1200_v36, %v378_v2  ;;  %1016 = vmatprep.mubr.msk.f32.mxu1 %vm427_vm4, %v415_v62 }
 0x11a   :  { %1017 = vmatmul.mubr.msk.f32.gmra.mrb[28].mxu1 %vm427_vm4, %v416_v0  ;;  %v418_v5 = vmax.f32 %v384_v1, 0.0 }
 0x11b   :  { %v417_v4 = vmax.f32 %v379_v3, 0.0 }
 0x11d   :  { %1019 = vmatprep.mubr.msk.f32.mxu1 %vm427_vm4, %v417_v4 }
 0x11e   :  { %1020 = vmatmul.mubr.msk.f32.gmra.mrb[30].mxu1 %vm427_vm4, %v418_v5 }
 0x1b5   :  { %v976_v7 = vpop.f32.mrb[0].mxu1 }
 0x1b6   :  { %v596_v8 = vadd.f32 %v976_v7, %v1269_v6  ;;  %v590_v36 = vpop.f32.mrb[1].mxu1 }
 0x1b7   :  { %v591_v9 = vadd.f32 %v1269_v6, %v590_v36 }
 0x1b8   :  { %751 = vst.msk [vmem:[%s1436_s5 + $0x8] sm:$0xff] %vm749_vm5, %v596_v8 }
 0x1b9   :  { %750 = vst.msk [vmem:[%s1436_s5] sm:$0xff] %vm749_vm5, %v591_v9  ;;  %v979_v10 = vpop.f32.mrb[2].mxu1 }
 0x1ba   :  { %v606_v11 = vadd.f32 %v979_v10, %v1269_v6  ;;  %v600_v12 = vpop.f32.mrb[3].mxu1 }
 0x1bb   :  { %v601_v13 = vadd.f32 %v1269_v6, %v600_v12 }
 0x1bc   :  { %753 = vst.msk [vmem:[%s1436_s5 + $0x18] sm:$0xff] %vm749_vm5, %v606_v11 }
 0x1bd   :  { %752 = vst.msk [vmem:[%s1436_s5 + $0x10] sm:$0xff] %vm749_vm5, %v601_v13  ;;  %v982_v14 = vpop.f32.mrb[4].mxu1 }
 0x1be   :  { %v616_v15 = vadd.f32 %v982_v14, %v1269_v6  ;;  %v610_v16 = vpop.f32.mrb[5].mxu1 }
 0x1bf   :  { %v611_v17 = vadd.f32 %v1269_v6, %v610_v16 }
 0x1c0   :  { %755 = vst.msk [vmem:[%s1436_s5 + $0x28] sm:$0xff] %vm749_vm5, %v616_v15 }
 0x1c1   :  { %754 = vst.msk [vmem:[%s1436_s5 + $0x20] sm:$0xff] %vm749_vm5, %v611_v17  ;;  %v985_v18 = vpop.f32.mrb[6].mxu1 }
 0x1c2   :  { %v626_v19 = vadd.f32 %v985_v18, %v1269_v6  ;;  %v620_v20 = vpop.f32.mrb[7].mxu1 }
 0x1c3   :  { %v621_v21 = vadd.f32 %v1269_v6, %v620_v20 }
 0x1c4   :  { %757 = vst.msk [vmem:[%s1436_s5 + $0x38] sm:$0xff] %vm749_vm5, %v626_v19 }
 0x1c5   :  { %756 = vst.msk [vmem:[%s1436_s5 + $0x30] sm:$0xff] %vm749_vm5, %v621_v21  ;;  %v988_v22 = vpop.f32.mrb[8].mxu1 }
 0x1c6   :  { %v636_v23 = vadd.f32 %v988_v22, %v1269_v6  ;;  %v630_v24 = vpop.f32.mrb[9].mxu1 }
 0x1c7   :  { %v631_v25 = vadd.f32 %v1269_v6, %v630_v24 }
 0x1c8   :  { %759 = vst.msk [vmem:[%s1436_s5 + $0x48] sm:$0xff] %vm749_vm5, %v636_v23 }
 0x1c9   :  { %758 = vst.msk [vmem:[%s1436_s5 + $0x40] sm:$0xff] %vm749_vm5, %v631_v25  ;;  %v991_v26 = vpop.f32.mrb[10].mxu1 }
 0x1ca   :  { %v646_v27 = vadd.f32 %v991_v26, %v1269_v6  ;;  %v640_v28 = vpop.f32.mrb[11].mxu1 }
 0x1cb   :  { %v641_v29 = vadd.f32 %v1269_v6, %v640_v28 }
 0x1cc   :  { %761 = vst.msk [vmem:[%s1436_s5 + $0x58] sm:$0xff] %vm749_vm5, %v646_v27 }
 0x1cd   :  { %760 = vst.msk [vmem:[%s1436_s5 + $0x50] sm:$0xff] %vm749_vm5, %v641_v29  ;;  %v994_v30 = vpop.f32.mrb[12].mxu1 }
 0x1ce   :  { %v656_v31 = vadd.f32 %v994_v30, %v1269_v6  ;;  %v650_v32 = vpop.f32.mrb[13].mxu1 }
 0x1cf   :  { %v651_v33 = vadd.f32 %v1269_v6, %v650_v32 }
 0x1d0   :  { %763 = vst.msk [vmem:[%s1436_s5 + $0x68] sm:$0xff] %vm749_vm5, %v656_v31 }
 0x1d1   :  { %762 = vst.msk [vmem:[%s1436_s5 + $0x60] sm:$0xff] %vm749_vm5, %v651_v33  ;;  %v997_v34 = vpop.f32.mrb[14].mxu1 }
 0x1d2   :  { %v666_v35 = vadd.f32 %v997_v34, %v1269_v6  ;;  %v660_v37 = vpop.f32.mrb[15].mxu1 }
 0x1d3   :  { %v661_v38 = vadd.f32 %v1269_v6, %v660_v37 }
 0x1d4   :  { %765 = vst.msk [vmem:[%s1436_s5 + $0x78] sm:$0xff] %vm749_vm5, %v666_v35 }
 0x1d5   :  { %764 = vst.msk [vmem:[%s1436_s5 + $0x70] sm:$0xff] %vm749_vm5, %v661_v38  ;;  %v1000_v39 = vpop.f32.mrb[16].mxu1 }
 0x1d6   :  { %v676_v40 = vadd.f32 %v1000_v39, %v1269_v6  ;;  %v670_v41 = vpop.f32.mrb[17].mxu1 }
 0x1d7   :  { %v671_v42 = vadd.f32 %v1269_v6, %v670_v41 }
 0x1d8   :  { %767 = vst.msk [vmem:[%s1436_s5 + $0x88] sm:$0xff] %vm749_vm5, %v676_v40 }
 0x1d9   :  { %766 = vst.msk [vmem:[%s1436_s5 + $0x80] sm:$0xff] %vm749_vm5, %v671_v42  ;;  %v1003_v43 = vpop.f32.mrb[18].mxu1 }
 0x1da   :  { %v686_v44 = vadd.f32 %v1003_v43, %v1269_v6  ;;  %v680_v45 = vpop.f32.mrb[19].mxu1 }
 0x1db   :  { %v681_v46 = vadd.f32 %v1269_v6, %v680_v45 }
 0x1dc   :  { %769 = vst.msk [vmem:[%s1436_s5 + $0x98] sm:$0xff] %vm749_vm5, %v686_v44 }
 0x1dd   :  { %768 = vst.msk [vmem:[%s1436_s5 + $0x90] sm:$0xff] %vm749_vm5, %v681_v46  ;;  %v1006_v47 = vpop.f32.mrb[20].mxu1 }
 0x1de   :  { %v696_v48 = vadd.f32 %v1006_v47, %v1269_v6  ;;  %v690_v49 = vpop.f32.mrb[21].mxu1 }
 0x1df   :  { %v691_v50 = vadd.f32 %v1269_v6, %v690_v49 }
 0x1e0   :  { %771 = vst.msk [vmem:[%s1436_s5 + $0xa8] sm:$0xff] %vm749_vm5, %v696_v48 }
 0x1e1   :  { %770 = vst.msk [vmem:[%s1436_s5 + $0xa0] sm:$0xff] %vm749_vm5, %v691_v50  ;;  %v1009_v51 = vpop.f32.mrb[22].mxu1 }
 0x1e2   :  { %v706_v52 = vadd.f32 %v1009_v51, %v1269_v6  ;;  %v700_v53 = vpop.f32.mrb[23].mxu1 }
 0x1e3   :  { %v701_v54 = vadd.f32 %v1269_v6, %v700_v53 }
 0x1e4   :  { %773 = vst.msk [vmem:[%s1436_s5 + $0xb8] sm:$0xff] %vm749_vm5, %v706_v52 }
 0x1e5   :  { %772 = vst.msk [vmem:[%s1436_s5 + $0xb0] sm:$0xff] %vm749_vm5, %v701_v54  ;;  %v1012_v55 = vpop.f32.mrb[24].mxu1 }
 0x1e6   :  { %v716_v56 = vadd.f32 %v1012_v55, %v1269_v6  ;;  %v710_v57 = vpop.f32.mrb[25].mxu1 }
 0x1e7   :  { %v711_v58 = vadd.f32 %v1269_v6, %v710_v57 }
 0x1e8   :  { %775 = vst.msk [vmem:[%s1436_s5 + $0xc8] sm:$0xff] %vm749_vm5, %v716_v56 }
 0x1e9   :  { %774 = vst.msk [vmem:[%s1436_s5 + $0xc0] sm:$0xff] %vm749_vm5, %v711_v58  ;;  %v1015_v59 = vpop.f32.mrb[26].mxu1 }
 0x1ea   :  { %v726_v60 = vadd.f32 %v1015_v59, %v1269_v6  ;;  %v720_v61 = vpop.f32.mrb[27].mxu1 }
 0x1eb   :  { %v721_v62 = vadd.f32 %v1269_v6, %v720_v61 }
 0x1ec   :  { %777 = vst.msk [vmem:[%s1436_s5 + $0xd8] sm:$0xff] %vm749_vm5, %v726_v60 }
 0x1ed   :  { %776 = vst.msk [vmem:[%s1436_s5 + $0xd0] sm:$0xff] %vm749_vm5, %v721_v62  ;;  %v1018_v63 = vpop.f32.mrb[28].mxu1 }
 0x1ee   :  { %v736_v0 = vadd.f32 %v1018_v63, %v1269_v6  ;;  %v730_v1 = vpop.f32.mrb[29].mxu1 }
 0x1ef   :  { %v731_v2 = vadd.f32 %v1269_v6, %v730_v1 }
 0x1f0   :  { %779 = vst.msk [vmem:[%s1436_s5 + $0xe8] sm:$0xff] %vm749_vm5, %v736_v0 }
 0x1f1   :  { %778 = vst.msk [vmem:[%s1436_s5 + $0xe0] sm:$0xff] %vm749_vm5, %v731_v2  ;;  %v1021_v3 = vpop.f32.mrb[30].mxu1 }
 0x1f2   :  { %v746_v4 = vadd.f32 %v1021_v3, %v1269_v6  ;;  %v740_v5 = vpop.f32.mrb[31].mxu1 }
 0x1f3   :  { %v741_v7 = vadd.f32 %v1269_v6, %v740_v5 }
 0x1f4   :  { %781 = vst.msk [vmem:[%s1436_s5 + $0xf8] sm:$0xff] %vm749_vm5, %v746_v4 }
 0x1f5   :  { %780 = vst.msk [vmem:[%s1436_s5 + $0xf0] sm:$0xff] %vm749_vm5, %v741_v7 }

</bundles_post_ra>
